<compile_context>
chip_gen: v5e
topology: v5e:2x2
jax: 0.10.0
libtpu: 0.0.40
codegen_flags: <defaults>
</compile_context>

<pallas_src>
import functools

import jax
import jax.numpy as jnp
from jax.experimental import pallas as pl
from jax.experimental.pallas import tpu as pltpu


def _round_up(x, m):
    return ((x + m - 1) // m) * m


def _nbytes(shape, dtype):
    n = 1
    for s in shape:
        n *= int(s)
    return n * jnp.dtype(dtype).itemsize


def net2_kernel(x_ref, w0_ref, b0_ref, w1s_ref, b1s_ref, w2s_ref, b2s_ref, o_ref):
    """Full Net2 forward for one batch tile, entirely in VMEM.

    x_ref  : (TB, Fp)              bf16
    w0_ref : (Fp, Np) bf16,        b0_ref : (1, Np) f32
    w1s_ref: (nb, Np, Np) bf16,    b1s_ref: (nb, 1, Np) f32   -- linear1 of each residual block
    w2s_ref: (nb, Np, Np) bf16,    b2s_ref: (nb, 1, Np) f32   -- linear2 of each residual block
    o_ref  : (TB, Np)              f32
    """
    wdt = w0_ref.dtype

    # Input layer: Linear -> ReLU -> Dropout(eval = identity).
    h = jnp.dot(x_ref[...], w0_ref[...], preferred_element_type=jnp.float32)
    h = jnp.maximum(h + b0_ref[...], 0.0)

    def residual_block(i, h):
        identity = h  # in_features == out_features -> skip connection is Identity
        t = jnp.dot(h.astype(wdt), w1s_ref[i], preferred_element_type=jnp.float32)
        t = jnp.maximum(t + b1s_ref[i], 0.0)       # relu(linear1(x)); dropout(eval)=identity
        t = jnp.dot(t.astype(wdt), w2s_ref[i], preferred_element_type=jnp.float32)
        t = t + b2s_ref[i]
        return jnp.maximum(t + identity, 0.0)      # relu(out + identity)

    nb = w1s_ref.shape[0]  # static at trace time
    if nb <= 8:
        # Small block counts: plain unrolled Python loop (static indices).
        for i in range(nb):
            h = residual_block(i, h)
    else:
        # Large block counts: fori_loop (unrolled) bounds live ranges / code size.
        h = jax.lax.fori_loop(0, nb, residual_block, h, unroll=True)

    o_ref[...] = h.astype(o_ref.dtype)


@functools.partial(jax.jit, static_argnames=("tile_b",))
def net2_forward(x, w0, b0, w1s, b1s, w2s, b2s, *, tile_b=128):
    B, F = x.shape
    N = w0.shape[1]
    nb = w1s.shape[0]

    # Lane-dense padding: last dims to multiples of 128, batch tile to a multiple of 8.
    Fp = _round_up(F, 128)
    Np = _round_up(N, 128)
    tb = min(tile_b, _round_up(B, 8))
    Bp = _round_up(B, tb)

    bf16 = jnp.bfloat16
    f32 = jnp.float32

    # Zero-padding keeps semantics exact: padded columns stay 0 through every layer.
    x_p = jnp.pad(x, ((0, Bp - B), (0, Fp - F))).astype(bf16)
    w0_p = jnp.pad(w0, ((0, Fp - F), (0, Np - N))).astype(bf16)
    b0_p = jnp.pad(b0, ((0, 0), (0, Np - N))).astype(f32)
    w1s_p = jnp.pad(w1s, ((0, 0), (0, Np - N), (0, Np - N))).astype(bf16)
    b1s_p = jnp.pad(b1s, ((0, 0), (0, 0), (0, Np - N))).astype(f32)
    w2s_p = jnp.pad(w2s, ((0, 0), (0, Np - N), (0, Np - N))).astype(bf16)
    b2s_p = jnp.pad(b2s, ((0, 0), (0, 0), (0, Np - N))).astype(f32)

    grid = (Bp // tb,)

    # VMEM budget: double-buffered blocks + activation temporaries; clamp at 64 MiB (v7x-safe).
    block_bytes = (
        _nbytes((tb, Fp), bf16)
        + _nbytes((Fp, Np), bf16) + _nbytes((1, Np), f32)
        + 2 * _nbytes((nb, Np, Np), bf16) + 2 * _nbytes((nb, 1, Np), f32)
        + _nbytes((tb, Np), f32)
    )
    vmem_limit = int(min(max(2 * block_bytes + 8 * _nbytes((tb, Np), f32),
                             32 * 1024 * 1024),
                         64 * 1024 * 1024))

    cost = pl.CostEstimate(
        flops=2 * Bp * (Fp * Np + 2 * nb * Np * Np),
        transcendentals=0,
        bytes_accessed=(
            _nbytes((Bp, Fp), bf16) + _nbytes((Fp, Np), bf16) + _nbytes((1, Np), f32)
            + 2 * _nbytes((nb, Np, Np), bf16) + 2 * _nbytes((nb, 1, Np), f32)
            + _nbytes((Bp, Np), f32)
        ),
    )

    out_p = pl.pallas_call(
        net2_kernel,
        out_shape=jax.ShapeDtypeStruct((Bp, Np), f32),
        grid_spec=pltpu.PrefetchScalarGridSpec(
            num_scalar_prefetch=0,
            grid=grid,
            in_specs=[
                pl.BlockSpec((tb, Fp), lambda i: (i, 0)),         # x: tiled over batch
                pl.BlockSpec((Fp, Np), lambda i: (0, 0)),         # w0 (resident)
                pl.BlockSpec((1, Np), lambda i: (0, 0)),          # b0 (resident)
                pl.BlockSpec((nb, Np, Np), lambda i: (0, 0, 0)),  # w1 stack (resident)
                pl.BlockSpec((nb, 1, Np), lambda i: (0, 0, 0)),   # b1 stack (resident)
                pl.BlockSpec((nb, Np, Np), lambda i: (0, 0, 0)),  # w2 stack (resident)
                pl.BlockSpec((nb, 1, Np), lambda i: (0, 0, 0)),   # b2 stack (resident)
            ],
            out_specs=pl.BlockSpec((tb, Np), lambda i: (i, 0)),   # lane-dense: Np % 128 == 0
        ),
        compiler_params=pltpu.CompilerParams(
            dimension_semantics=("parallel",),
            vmem_limit_bytes=vmem_limit,
        ),
        cost_estimate=cost,
    )(x_p, w0_p, b0_p, w1s_p, b1s_p, w2s_p, b2s_p)

    return out_p[:B, :N]


def init_params(key, num_features, num_neurons, num_residual_blocks):
    """Deterministic init mimicking nn.Linear default U(-1/sqrt(fan_in), 1/sqrt(fan_in))."""
    ks = jax.random.split(key, 1 + 2 * num_residual_blocks)

    def lin(k, fan_in, fan_out):
        kw, kb = jax.random.split(k)
        bound = 1.0 / float(fan_in) ** 0.5
        w = jax.random.uniform(kw, (fan_in, fan_out), jnp.float32, -bound, bound)
        b = jax.random.uniform(kb, (1, fan_out), jnp.float32, -bound, bound)
        return w, b

    w0, b0 = lin(ks[0], num_features, num_neurons)
    w1s, b1s, w2s, b2s = [], [], [], []
    for r in range(num_residual_blocks):
        w1, b1 = lin(ks[1 + 2 * r], num_neurons, num_neurons)
        w2, b2 = lin(ks[2 + 2 * r], num_neurons, num_neurons)
        w1s.append(w1[None]); b1s.append(b1[None])
        w2s.append(w2[None]); b2s.append(b2[None])
    return (w0, b0,
            jnp.concatenate(w1s, axis=0), jnp.concatenate(b1s, axis=0),   # (nb,N,N), (nb,1,N)
            jnp.concatenate(w2s, axis=0), jnp.concatenate(b2s, axis=0))


def net2_reference(x, w0, b0, w1s, b1s, w2s, b2s):
    """Pure-JAX reference of Net2.forward (eval mode), same bf16-operand /
    f32-accumulate precision as the kernel."""
    bf16 = jnp.bfloat16
    h = jnp.dot(x.astype(bf16), w0.astype(bf16), preferred_element_type=jnp.float32)
    h = jnp.maximum(h + b0, 0.0)
    for i in range(w1s.shape[0]):
        ident = h
        t = jnp.dot(h.astype(bf16), w1s[i].astype(bf16), preferred_element_type=jnp.float32)
        t = jnp.maximum(t + b1s[i], 0.0)
        t = jnp.dot(t.astype(bf16), w2s[i].astype(bf16), preferred_element_type=jnp.float32) + b2s[i]
        h = jnp.maximum(t + ident, 0.0)
    return h


if __name__ == "__main__":
    key = jax.random.PRNGKey(0)
    kx, kp = jax.random.split(key)

    batch = 256                 # 2 full batch tiles of 128 -> both v7x TensorCores get work
    num_features = 16
    num_neurons = 32
    num_residual_blocks = 2

    x = jax.random.normal(kx, (batch, num_features), jnp.float32)
    params = init_params(kp, num_features, num_neurons, num_residual_blocks)

    out = net2_forward(x, *params, tile_b=128)
    out = jax.block_until_ready(out)

    ref = net2_reference(x, *params)
    assert out.shape == (batch, num_neurons)
    assert jnp.allclose(out, ref, atol=2e-3, rtol=2e-3), "mismatch vs reference"

    print("KERNEL_OK")
</pallas_src>

<mosaic_0001>
module attributes {stable_mosaic.version = 11 : i64} {
  func.func @net2_kernel(%arg0: i32, %arg1: memref<128x128xbf16, #tpu.memory_space<vmem>>, %arg2: memref<128x128xbf16, #tpu.memory_space<vmem>>, %arg3: memref<1x128xf32, #tpu.memory_space<vmem>>, %arg4: memref<2x128x128xbf16, #tpu.memory_space<vmem>>, %arg5: memref<2x1x128xf32, #tpu.memory_space<vmem>>, %arg6: memref<2x128x128xbf16, #tpu.memory_space<vmem>>, %arg7: memref<2x1x128xf32, #tpu.memory_space<vmem>>, %arg8: memref<128x128xf32, #tpu.memory_space<vmem>>) attributes {dimension_semantics = [#tpu.dimension_semantics<parallel>], iteration_bounds = array<i64: 2>, scalar_prefetch = 0 : i64, scratch_operands = 0 : i64, tpu.core_type = #tpu.core_type<tc>, window_params = [{transform_indices = @transform_0, window_bounds = array<i64: 128, 128>}, {pipeline_mode = #tpu.pipeline_mode<synchronous>, transform_indices = @transform_1, window_bounds = array<i64: 128, 128>}, {pipeline_mode = #tpu.pipeline_mode<synchronous>, transform_indices = @transform_2, window_bounds = array<i64: 1, 128>}, {pipeline_mode = #tpu.pipeline_mode<synchronous>, transform_indices = @transform_3, window_bounds = array<i64: 2, 128, 128>}, {pipeline_mode = #tpu.pipeline_mode<synchronous>, transform_indices = @transform_4, window_bounds = array<i64: 2, 1, 128>}, {pipeline_mode = #tpu.pipeline_mode<synchronous>, transform_indices = @transform_5, window_bounds = array<i64: 2, 128, 128>}, {pipeline_mode = #tpu.pipeline_mode<synchronous>, transform_indices = @transform_6, window_bounds = array<i64: 2, 1, 128>}, {transform_indices = @transform_7, window_bounds = array<i64: 128, 128>}]} {
    %c0 = arith.constant 0 : index
    %c0_0 = arith.constant 0 : index
    %0 = vector.load %arg1[%c0, %c0_0] : memref<128x128xbf16, #tpu.memory_space<vmem>>, vector<128x128xbf16>
    %c0_1 = arith.constant 0 : index
    %c0_2 = arith.constant 0 : index
    %1 = vector.load %arg2[%c0_1, %c0_2] : memref<128x128xbf16, #tpu.memory_space<vmem>>, vector<128x128xbf16>
    %cst = arith.constant dense<0.000000e+00> : vector<128x128xf32>
    %2 = tpu.matmul %0, %1, %cst {dimension_numbers = #tpu.dot_dimension_numbers<[1], [0], [0], [1], [0, 0, 1, 1], [], []>} : vector<128x128xbf16>, vector<128x128xbf16>, vector<128x128xf32> -> vector<128x128xf32>
    %c0_3 = arith.constant 0 : index
    %c0_4 = arith.constant 0 : index
    %3 = vector.load %arg3[%c0_3, %c0_4] : memref<1x128xf32, #tpu.memory_space<vmem>>, vector<1x128xf32>
    %4 = vector.broadcast %3 : vector<1x128xf32> to vector<128x128xf32>
    %5 = arith.addf %2, %4 : vector<128x128xf32>
    %cst_5 = arith.constant 0.000000e+00 : f32
    %6 = vector.broadcast %cst_5 : f32 to vector<128x128xf32>
    %7 = arith.maximumf %5, %6 : vector<128x128xf32>
    %8 = arith.truncf %7 : vector<128x128xf32> to vector<128x128xbf16>
    %c0_6 = arith.constant 0 : index
    %c0_7 = arith.constant 0 : index
    %c0_8 = arith.constant 0 : index
    %9 = vector.load %arg4[%c0_6, %c0_7, %c0_8] : memref<2x128x128xbf16, #tpu.memory_space<vmem>>, vector<1x128x128xbf16>
    %10 = vector.shape_cast %9 : vector<1x128x128xbf16> to vector<128x128xbf16>
    %cst_9 = arith.constant dense<0.000000e+00> : vector<128x128xf32>
    %11 = tpu.matmul %8, %10, %cst_9 {dimension_numbers = #tpu.dot_dimension_numbers<[1], [0], [0], [1], [0, 0, 1, 1], [], []>} : vector<128x128xbf16>, vector<128x128xbf16>, vector<128x128xf32> -> vector<128x128xf32>
    %c0_10 = arith.constant 0 : index
    %c0_11 = arith.constant 0 : index
    %c0_12 = arith.constant 0 : index
    %12 = vector.load %arg5[%c0_10, %c0_11, %c0_12] : memref<2x1x128xf32, #tpu.memory_space<vmem>>, vector<1x1x128xf32>
    %13 = vector.shape_cast %12 : vector<1x1x128xf32> to vector<1x128xf32>
    %14 = vector.broadcast %13 : vector<1x128xf32> to vector<128x128xf32>
    %15 = arith.addf %11, %14 : vector<128x128xf32>
    %cst_13 = arith.constant 0.000000e+00 : f32
    %16 = vector.broadcast %cst_13 : f32 to vector<128x128xf32>
    %17 = arith.maximumf %15, %16 : vector<128x128xf32>
    %18 = arith.truncf %17 : vector<128x128xf32> to vector<128x128xbf16>
    %c0_14 = arith.constant 0 : index
    %c0_15 = arith.constant 0 : index
    %c0_16 = arith.constant 0 : index
    %19 = vector.load %arg6[%c0_14, %c0_15, %c0_16] : memref<2x128x128xbf16, #tpu.memory_space<vmem>>, vector<1x128x128xbf16>
    %20 = vector.shape_cast %19 : vector<1x128x128xbf16> to vector<128x128xbf16>
    %cst_17 = arith.constant dense<0.000000e+00> : vector<128x128xf32>
    %21 = tpu.matmul %18, %20, %cst_17 {dimension_numbers = #tpu.dot_dimension_numbers<[1], [0], [0], [1], [0, 0, 1, 1], [], []>} : vector<128x128xbf16>, vector<128x128xbf16>, vector<128x128xf32> -> vector<128x128xf32>
    %c0_18 = arith.constant 0 : index
    %c0_19 = arith.constant 0 : index
    %c0_20 = arith.constant 0 : index
    %22 = vector.load %arg7[%c0_18, %c0_19, %c0_20] : memref<2x1x128xf32, #tpu.memory_space<vmem>>, vector<1x1x128xf32>
    %23 = vector.shape_cast %22 : vector<1x1x128xf32> to vector<1x128xf32>
    %24 = vector.broadcast %23 : vector<1x128xf32> to vector<128x128xf32>
    %25 = arith.addf %21, %24 : vector<128x128xf32>
    %26 = arith.addf %25, %7 : vector<128x128xf32>
    %cst_21 = arith.constant 0.000000e+00 : f32
    %27 = vector.broadcast %cst_21 : f32 to vector<128x128xf32>
    %28 = arith.maximumf %26, %27 : vector<128x128xf32>
    %29 = arith.truncf %28 : vector<128x128xf32> to vector<128x128xbf16>
    %c1 = arith.constant 1 : index
    %c0_22 = arith.constant 0 : index
    %c0_23 = arith.constant 0 : index
    %30 = vector.load %arg4[%c1, %c0_22, %c0_23] : memref<2x128x128xbf16, #tpu.memory_space<vmem>>, vector<1x128x128xbf16>
    %31 = vector.shape_cast %30 : vector<1x128x128xbf16> to vector<128x128xbf16>
    %cst_24 = arith.constant dense<0.000000e+00> : vector<128x128xf32>
    %32 = tpu.matmul %29, %31, %cst_24 {dimension_numbers = #tpu.dot_dimension_numbers<[1], [0], [0], [1], [0, 0, 1, 1], [], []>} : vector<128x128xbf16>, vector<128x128xbf16>, vector<128x128xf32> -> vector<128x128xf32>
    %c1_25 = arith.constant 1 : index
    %c0_26 = arith.constant 0 : index
    %c0_27 = arith.constant 0 : index
    %33 = vector.load %arg5[%c1_25, %c0_26, %c0_27] : memref<2x1x128xf32, #tpu.memory_space<vmem>>, vector<1x1x128xf32>
    %34 = vector.shape_cast %33 : vector<1x1x128xf32> to vector<1x128xf32>
    %35 = vector.broadcast %34 : vector<1x128xf32> to vector<128x128xf32>
    %36 = arith.addf %32, %35 : vector<128x128xf32>
    %cst_28 = arith.constant 0.000000e+00 : f32
    %37 = vector.broadcast %cst_28 : f32 to vector<128x128xf32>
    %38 = arith.maximumf %36, %37 : vector<128x128xf32>
    %39 = arith.truncf %38 : vector<128x128xf32> to vector<128x128xbf16>
    %c1_29 = arith.constant 1 : index
    %c0_30 = arith.constant 0 : index
    %c0_31 = arith.constant 0 : index
    %40 = vector.load %arg6[%c1_29, %c0_30, %c0_31] : memref<2x128x128xbf16, #tpu.memory_space<vmem>>, vector<1x128x128xbf16>
    %41 = vector.shape_cast %40 : vector<1x128x128xbf16> to vector<128x128xbf16>
    %cst_32 = arith.constant dense<0.000000e+00> : vector<128x128xf32>
    %42 = tpu.matmul %39, %41, %cst_32 {dimension_numbers = #tpu.dot_dimension_numbers<[1], [0], [0], [1], [0, 0, 1, 1], [], []>} : vector<128x128xbf16>, vector<128x128xbf16>, vector<128x128xf32> -> vector<128x128xf32>
    %c1_33 = arith.constant 1 : index
    %c0_34 = arith.constant 0 : index
    %c0_35 = arith.constant 0 : index
    %43 = vector.load %arg7[%c1_33, %c0_34, %c0_35] : memref<2x1x128xf32, #tpu.memory_space<vmem>>, vector<1x1x128xf32>
    %44 = vector.shape_cast %43 : vector<1x1x128xf32> to vector<1x128xf32>
    %45 = vector.broadcast %44 : vector<1x128xf32> to vector<128x128xf32>
    %46 = arith.addf %42, %45 : vector<128x128xf32>
    %47 = arith.addf %46, %28 : vector<128x128xf32>
    %cst_36 = arith.constant 0.000000e+00 : f32
    %48 = vector.broadcast %cst_36 : f32 to vector<128x128xf32>
    %49 = arith.maximumf %47, %48 : vector<128x128xf32>
    %c0_37 = arith.constant 0 : index
    %c0_38 = arith.constant 0 : index
    %50 = vector.load %arg8[%c0_37, %c0_38] : memref<128x128xf32, #tpu.memory_space<vmem>>, vector<128x128xf32>
    tpu.vector_store %arg8[%c0_37, %c0_38], %49 {strides = array<i32>} : memref<128x128xf32, #tpu.memory_space<vmem>>, vector<128x128xf32>,
    return
  }
  func.func @transform_0(%arg0: i32) -> (i32, i32) {
    %c0_i32 = arith.constant 0 : i32
    %c0_i32_0 = arith.constant 0 : i32
    return %arg0, %c0_i32 : i32, i32
  }
  func.func @transform_1(%arg0: i32) -> (i32, i32) {
    %c0_i32 = arith.constant 0 : i32
    %c0_i32_0 = arith.constant 0 : i32
    %c0_i32_1 = arith.constant 0 : i32
    return %c0_i32, %c0_i32_0 : i32, i32
  }
  func.func @transform_2(%arg0: i32) -> (i32, i32) {
    %c0_i32 = arith.constant 0 : i32
    %c0_i32_0 = arith.constant 0 : i32
    %c0_i32_1 = arith.constant 0 : i32
    return %c0_i32, %c0_i32_0 : i32, i32
  }
  func.func @transform_3(%arg0: i32) -> (i32, i32, i32) {
    %c0_i32 = arith.constant 0 : i32
    %c0_i32_0 = arith.constant 0 : i32
    %c0_i32_1 = arith.constant 0 : i32
    %c0_i32_2 = arith.constant 0 : i32
    return %c0_i32, %c0_i32_0, %c0_i32_1 : i32, i32, i32
  }
  func.func @transform_4(%arg0: i32) -> (i32, i32, i32) {
    %c0_i32 = arith.constant 0 : i32
    %c0_i32_0 = arith.constant 0 : i32
    %c0_i32_1 = arith.constant 0 : i32
    %c0_i32_2 = arith.constant 0 : i32
    return %c0_i32, %c0_i32_0, %c0_i32_1 : i32, i32, i32
  }
  func.func @transform_5(%arg0: i32) -> (i32, i32, i32) {
    %c0_i32 = arith.constant 0 : i32
    %c0_i32_0 = arith.constant 0 : i32
    %c0_i32_1 = arith.constant 0 : i32
    %c0_i32_2 = arith.constant 0 : i32
    return %c0_i32, %c0_i32_0, %c0_i32_1 : i32, i32, i32
  }
  func.func @transform_6(%arg0: i32) -> (i32, i32, i32) {
    %c0_i32 = arith.constant 0 : i32
    %c0_i32_0 = arith.constant 0 : i32
    %c0_i32_1 = arith.constant 0 : i32
    %c0_i32_2 = arith.constant 0 : i32
    return %c0_i32, %c0_i32_0, %c0_i32_1 : i32, i32, i32
  }
  func.func @transform_7(%arg0: i32) -> (i32, i32) {
    %c0_i32 = arith.constant 0 : i32
    %c0_i32_0 = arith.constant 0 : i32
    return %arg0, %c0_i32 : i32, i32
  }
}

</mosaic_0001>

<bundles_post_ra>
// kernel: net2_forward.1
= control target key start
LH: loop header
LB: loop body
LE: loop exit
PB: predicated region body
PF: predicated region fallthrough
CT: control target
= control target key end

     0   :  { %s1521_s24 = smov 0   ;;  %s1991_s0 = inlined_call_operand.vmem [shape: bf16[256,128], index: 0, kind: input, shape index: {}]   ;;  %s1992_s1 = inlined_call_operand.vmem [shape: bf16[128,128], index: 1, kind: input, shape index: {}]   ;;  %s1993_s2 = inlined_call_operand.vmem [shape: f32[1,128], index: 2, kind: input, shape index: {}]   ;;  %s1994_s3 = inlined_call_operand.vmem [shape: bf16[2,128,128], index: 3, kind: input, shape index: {}]   ;;  %s1995_s4 = inlined_call_operand.vmem [shape: f32[2,1,128], index: 4, kind: input, shape index: {}]   ;;  %s1996_s5 = inlined_call_operand.vmem [shape: bf16[2,128,128], index: 5, kind: input, shape index: {}]   ;;  %s1997_s6 = inlined_call_operand.vmem [shape: f32[2,1,128], index: 6, kind: input, shape index: {}]   ;;  %s1998_s7 = inlined_call_operand.vmem [shape: f32[256,128], index: 7, kind: output, shape index: {}]  }
   0x1 LB: > { %s1151_s25 = sadd.s32 4294967295, %s1479_s24   ;;  %p1155_p0 = scmp.ge.s32.totalorder %s1479_s24, 1  ;;  %s1479_s24 = sphi %s1521_s24, %s17_s24  }
   0x2   : > { %p238_p1 = scmp.lt.s32.totalorder %s1479_s24, 3 }
   0x4   : > { %p239_p2 = pnand %p1155_p0, %p238_p1 }
   0x5   : > { %s1156_s11 = sshll.u32 (!%p239_p2), %s1151_s25, 4 }
   0x6   : > { %242 = sbr.rel (%p239_p2) target bundleno = 870 (0x366), region = 48  ;;  %p271_p3 = scmp.lt.s32.totalorder (!%p239_p2), %s1156_s11, 31 }
   0xb   : > { %v1403_v0 = vld [vmem:[%s1992_s1 + $0x38] sm:$0xff]  ;;  %v1402_v1 = vld [vmem:[%s1992_s1 + $0x30] sm:$0xff]  ;;  %v1401_v2 = vld [vmem:[%s1992_s1 + $0x28] sm:$0xff]  ;;  %s2000_s11 = smov (!%p271_p3, %s1156_s11), 31 }
   0xc   : > { %414 = vmatpush.bf16.msra.mxu0 %v1403_v0  ;;  %1436 = vmatpush.bf16.msra.mxu1 %v1403_v0  ;;  %v1400_v3 = vld [vmem:[%s1992_s1 + $0x20] sm:$0xff]  ;;  %v1399_v4 = vld [vmem:[%s1992_s1 + $0x18] sm:$0xff]  ;;  %v1398_v5 = vld [vmem:[%s1992_s1 + $0x10] sm:$0xff]  ;;  %s1157_s18 = sshll.u32 %s2000_s11, 2  ;;  %s1159_s14 = sshll.u32 %s2000_s11, 3 }
   0xd   : > { %1437 = vmatpush.bf16.msra.mxu2 %v1403_v0  ;;  %1438 = vmatpush.bf16.msra.mxu3 %v1403_v0  ;;  %v1397_v6 = vld [vmem:[%s1992_s1 + $0x8] sm:$0xff]  ;;  %v1396_v7 = vld [vmem:[%s1992_s1] sm:$0xff]  ;;  %s274_s23 = scalar_lea.vmem %s1991_s0, %s1157_s18  ;;  %v1411_v8 = vld [vmem:[%s1994_s3 + $0x38] sm:$0xff]  ;;  %s1925_s17 = scalar_lea.vmem %s1998_s7, %s1159_s14 }
   0xe   : > { %v1388_v9 = vld [vmem:[%s274_s23] sm:$0xff]  ;;  %v1390_v10 = vld [vmem:[%s274_s23 + $0x10] sm:$0xff]  ;;  %v1409_v14 = vld [vmem:[%s1994_s3 + $0x28] sm:$0xff] }
   0xf   : > { %v1392_v11 = vld [vmem:[%s274_s23 + $0x20] sm:$0xff]  ;;  %v1394_v12 = vld [vmem:[%s274_s23 + $0x30] sm:$0xff]  ;;  %v1407_v16 = vld [vmem:[%s1994_s3 + $0x18] sm:$0xff] }
  0x10   : > { %415 = vmatpush.bf16.msra.mxu0 %v1402_v1  ;;  %1439 = vmatpush.bf16.msra.mxu1 %v1402_v1  ;;  %v1410_v13 = vld [vmem:[%s1994_s3 + $0x30] sm:$0xff]  ;;  %v1408_v15 = vld [vmem:[%s1994_s3 + $0x20] sm:$0xff]  ;;  %v1389_v17 = vld [vmem:[%s274_s23 + $0x8] sm:$0xff] }
  0x11   : > { %1440 = vmatpush.bf16.msra.mxu2 %v1402_v1  ;;  %1441 = vmatpush.bf16.msra.mxu3 %v1402_v1  ;;  %v1391_v18 = vld [vmem:[%s274_s23 + $0x18] sm:$0xff]  ;;  %v1393_v19 = vld [vmem:[%s274_s23 + $0x28] sm:$0xff]  ;;  %v1406_v21 = vld [vmem:[%s1994_s3 + $0x10] sm:$0xff] }
  0x12   : > { %v1395_v20 = vld [vmem:[%s274_s23 + $0x38] sm:$0xff]  ;;  %v1405_v22 = vld [vmem:[%s1994_s3 + $0x8] sm:$0xff]  ;;  %v1404_v23 = vld [vmem:[%s1994_s3] sm:$0xff] }
  0x13   : > { %v1586_v25 = vld [vmem:[%s1993_s2] ss:$0 sm:$0xff]  ;;  %v1419_v61 = vld [vmem:[%s1996_s5 + $0x38] sm:$0xff] }
  0x14   : > { %416 = vmatpush.bf16.msra.mxu0 %v1401_v2  ;;  %1442 = vmatpush.bf16.msra.mxu1 %v1401_v2 }
  0x15   : > { %1443 = vmatpush.bf16.msra.mxu2 %v1401_v2  ;;  %1444 = vmatpush.bf16.msra.mxu3 %v1401_v2 }
  0x18   : > { %417 = vmatpush.bf16.msra.mxu0 %v1400_v3  ;;  %1445 = vmatpush.bf16.msra.mxu1 %v1400_v3 }
  0x19   : > { %1446 = vmatpush.bf16.msra.mxu2 %v1400_v3  ;;  %1447 = vmatpush.bf16.msra.mxu3 %v1400_v3 }
  0x1c   : > { %418 = vmatpush.bf16.msra.mxu0 %v1399_v4  ;;  %1448 = vmatpush.bf16.msra.mxu1 %v1399_v4 }
  0x1d   : > { %1449 = vmatpush.bf16.msra.mxu2 %v1399_v4  ;;  %1450 = vmatpush.bf16.msra.mxu3 %v1399_v4 }
  0x20   : > { %419 = vmatpush.bf16.msra.mxu0 %v1398_v5  ;;  %1451 = vmatpush.bf16.msra.mxu1 %v1398_v5 }
  0x21   : > { %1452 = vmatpush.bf16.msra.mxu2 %v1398_v5  ;;  %1453 = vmatpush.bf16.msra.mxu3 %v1398_v5 }
  0x24   : > { %420 = vmatpush.bf16.msra.mxu0 %v1397_v6  ;;  %1454 = vmatpush.bf16.msra.mxu1 %v1397_v6 }
  0x25   : > { %1455 = vmatpush.bf16.msra.mxu2 %v1397_v6  ;;  %1456 = vmatpush.bf16.msra.mxu3 %v1397_v6  ;;  %v1418_v6 = vld [vmem:[%s1996_s5 + $0x30] sm:$0xff] }
  0x28   : > { %421 = vmatpush.bf16.msra.mxu0 %v1396_v7  ;;  %1457 = vmatpush.bf16.msra.mxu1 %v1396_v7 }
  0x29   : > { %1458 = vmatpush.bf16.msra.mxu2 %v1396_v7  ;;  %1459 = vmatpush.bf16.msra.mxu3 %v1396_v7  ;;  %v1417_v7 = vld [vmem:[%s1996_s5 + $0x28] sm:$0xff] }
  0x2b   : > { %422 = vmatmul.bf16.vlgmr.msra.gmra.mxu0 %v1388_v9  ;;  %432 = vmatmul.bf16.vlgmr.msra.gmra.mxu1 %v1390_v10 }
  0x2c   : > { %555 = vmatpush.bf16.msrb.mxu1 %v1411_v8  ;;  %442 = vmatmul.bf16.vlgmr.msra.gmra.mxu2 %v1392_v11  ;;  %v1416_v8 = vld [vmem:[%s1996_s5 + $0x20] sm:$0xff] }
  0x2d   : > { %452 = vmatmul.bf16.vlgmr.msra.gmra.mxu3 %v1394_v12  ;;  %696 = vmatpush.bf16.msrb.mxu2 %v1419_v61  ;;  %v1415_v12 = vld [vmem:[%s1996_s5 + $0x18] sm:$0xff] }
  0x30   : > { %556 = vmatpush.bf16.msrb.mxu1 %v1410_v13 }
  0x31   : > { %697 = vmatpush.bf16.msrb.mxu2 %v1418_v6 }
  0x34   : > { %557 = vmatpush.bf16.msrb.mxu1 %v1409_v14 }
  0x35   : > { %698 = vmatpush.bf16.msrb.mxu2 %v1417_v7 }
  0x38   : > { %558 = vmatpush.bf16.msrb.mxu1 %v1408_v15 }
  0x39   : > { %699 = vmatpush.bf16.msrb.mxu2 %v1416_v8 }
  0x3b   : > { %427 = vmatmul.bf16.gmra.mxu0 %v1389_v17  ;;  %437 = vmatmul.bf16.gmra.mxu1 %v1391_v18  ;;  %v1413_v17 = vld [vmem:[%s1996_s5 + $0x8] sm:$0xff] }
  0x3c   : > { %559 = vmatpush.bf16.msrb.mxu1 %v1407_v16  ;;  %447 = vmatmul.bf16.gmra.mxu2 %v1393_v19  ;;  %v1414_v16 = vld [vmem:[%s1996_s5 + $0x10] sm:$0xff] }
  0x3d   : > { %457 = vmatmul.bf16.gmra.mxu3 %v1395_v20  ;;  %700 = vmatpush.bf16.msrb.mxu2 %v1415_v12 }
  0x40   : > { %560 = vmatpush.bf16.msrb.mxu1 %v1406_v21  ;;  %v1412_v21 = vld [vmem:[%s1996_s5] sm:$0xff] }
  0x41   : > { %701 = vmatpush.bf16.msrb.mxu2 %v1414_v16 }
  0x44   : > { %561 = vmatpush.bf16.msrb.mxu1 %v1405_v22 }
  0x45   : > { %702 = vmatpush.bf16.msrb.mxu2 %v1413_v17 }
  0x48   : > { %562 = vmatpush.bf16.msrb.mxu1 %v1404_v23 }
  0x49   : > { %703 = vmatpush.bf16.msrb.mxu2 %v1412_v21 }
  0xa8   : > { %v423_v24 = vpop.f32.mrf.mxu0  ;;  %v433_v33 = vpop.f32.mrf.mxu1 }
  0xa9   : > { %v1589_v26 = vadd.f32 %v1586_v25, %v423_v24  ;;  %v1613_v41 = vadd.f32 %v1586_v25, %v433_v33 }
  0xab   : > { %v463_v29 = vmax.f32 %v1589_v26, 0.0  ;;  %v467_v44 = vmax.f32 %v1613_v41, 0.0 }
  0xaf   : > { %v443_v48 = vpop.f32.mrf.mxu2 }
  0xb0   : > { %v425_v27 = vpop.f32.mrf.mxu0  ;;  %v435_v40 = vpop.f32.mrf.mxu1  ;;  %v1637_v55 = vadd.f32 %v1586_v25, %v443_v48 }
  0xb1   : > { %v1592_v28 = vadd.f32 %v1586_v25, %v425_v27  ;;  %v1616_v42 = vadd.f32 %v1586_v25, %v435_v40  ;;  %v453_v63 = vpop.f32.mrf.mxu3 }
  0xb2   : > { %v471_v58 = vmax.f32 %v1637_v55, 0.0  ;;  %v1673_v9 = vadd.f32 %v1586_v25, %v453_v63 }
  0xb3   : > { %v464_v30 = vmax.f32 %v1592_v28, 0.0  ;;  %v468_v45 = vmax.f32 %v1616_v42, 0.0 }
  0xb4   : > { %v475_v13 = vmax.f32 %v1673_v9, 0.0 }
  0xb5   : > { %v479_v31 = vpack.c.bf16 %v464_v30, %v463_v29  ;;  %v481_v46 = vpack.c.bf16 %v468_v45, %v467_v44 }
  0xb7   : > { %563 = vmatmul.bf16.vlgmr.msrb.gmra.mxu1 %v479_v31  ;;  %v445_v54 = vpop.f32.mrf.mxu2 }
  0xb8   : > { %v428_v32 = vpop.f32.mrf.mxu0  ;;  %v438_v43 = vpop.f32.mrf.mxu1  ;;  %v1640_v56 = vadd.f32 %v1586_v25, %v445_v54 }
  0xb9   : > { %v1601_v34 = vadd.f32 %v1586_v25, %v428_v32  ;;  %v1625_v49 = vadd.f32 %v1586_v25, %v438_v43  ;;  %v455_v5 = vpop.f32.mrf.mxu3 }
  0xba   : > { %v472_v59 = vmax.f32 %v1640_v56, 0.0  ;;  %v1676_v10 = vadd.f32 %v1586_v25, %v455_v5 }
  0xbb   : > { %v465_v37 = vmax.f32 %v1601_v34, 0.0  ;;  %v469_v51 = vmax.f32 %v1625_v49, 0.0 }
  0xbc   : > { %v483_v60 = vpack.c.bf16 %v472_v59, %v471_v58  ;;  %v476_v14 = vmax.f32 %v1676_v10, 0.0  ;;  %v1431_v10 = vld [vmem:[%s1996_s5 + $0x58] sm:$0xff] }
  0xbe   : > { %v485_v15 = vpack.c.bf16 %v476_v14, %v475_v13 }
  0xbf   : > { %v448_v57 = vpop.f32.mrf.mxu2 }
  0xc0   : > { %v430_v35 = vpop.f32.mrf.mxu0  ;;  %v440_v47 = vpop.f32.mrf.mxu1  ;;  %v1652_v0 = vadd.f32 %v1586_v25, %v448_v57 }
  0xc1   : > { %v1604_v36 = vadd.f32 %v1586_v25, %v430_v35  ;;  %v1628_v50 = vadd.f32 %v1586_v25, %v440_v47  ;;  %v458_v11 = vpop.f32.mrf.mxu3 }
  0xc2   : > { %v473_v2 = vmax.f32 %v1652_v0, 0.0  ;;  %v1694_v19 = vadd.f32 %v1586_v25, %v458_v11  ;;  %v1435_v0 = vld [vmem:[%s1996_s5 + $0x78] sm:$0xff] }
  0xc3   : > { %v466_v38 = vmax.f32 %v1604_v36, 0.0  ;;  %v470_v52 = vmax.f32 %v1628_v50, 0.0  ;;  %998 = vmatpush.bf16.msrb.mxu0 %v1435_v0 }
  0xc4   : > { %v477_v22 = vmax.f32 %v1694_v19, 0.0 }
  0xc5   : > { %v480_v39 = vpack.c.bf16 %v466_v38, %v465_v37  ;;  %v482_v53 = vpack.c.bf16 %v470_v52, %v469_v51 }
  0xc7   : > { %568 = vmatmul.bf16.gmra.mxu1 %v480_v39  ;;  %v450_v62 = vpop.f32.mrf.mxu2 }
  0xc8   : > { %v1655_v1 = vadd.f32 %v1586_v25, %v450_v62 }
  0xc9   : > { %v460_v18 = vpop.f32.mrf.mxu3 }
  0xca   : > { %v474_v3 = vmax.f32 %v1655_v1, 0.0  ;;  %v1697_v20 = vadd.f32 %v1586_v25, %v460_v18  ;;  %v1711_v25 = vld [vmem:[%s1995_s4] ss:$0 sm:$0xff]  ;;  %v1434_v1 = vld [vmem:[%s1996_s5 + $0x70] sm:$0xff] }
  0xcb   : > { %999 = vmatpush.bf16.msrb.mxu0 %v1434_v1 }
  0xcc   : > { %v484_v4 = vpack.c.bf16 %v474_v3, %v473_v2  ;;  %v478_v23 = vmax.f32 %v1697_v20, 0.0  ;;  %v1471_v20 = vld [vmem:[%s1995_s4 + $0x1] ss:$0 sm:$0xff] }
  0xce   : > { %v486_v24 = vpack.c.bf16 %v478_v23, %v477_v22 }
  0xd7   : > { %573 = vmatmul.bf16.gmra.mxu1 %v481_v46 }
  0xe7   : > { %578 = vmatmul.bf16.gmra.mxu1 %v482_v53 }
  0xf7   : > { %583 = vmatmul.bf16.gmra.mxu1 %v483_v60 }
 0x107   : > { %588 = vmatmul.bf16.gmra.mxu1 %v484_v4 }
 0x117   : > { %593 = vmatmul.bf16.gmra.mxu1 %v485_v15 }
 0x127   : > { %598 = vmatmul.bf16.gmra.mxu1 %v486_v24 }
 0x134   : > { %v564_v27 = vpop.f32.mrf.mxu1 }
 0x135   : > { %v565_v31 = vadd.f32 %v1711_v25, %v564_v27 }
 0x137   : > { %v604_v35 = vmax.f32 %v565_v31, 0.0 }
 0x13c   : > { %v566_v32 = vpop.f32.mrf.mxu1 }
 0x13d   : > { %v567_v33 = vadd.f32 %v1711_v25, %v566_v32 }
 0x13f   : > { %v605_v39 = vmax.f32 %v567_v33, 0.0 }
 0x141   : > { %v620_v40 = vpack.c.bf16 %v605_v39, %v604_v35 }
 0x143   : > { %704 = vmatmul.bf16.vlgmr.msrb.gmra.mxu2 %v620_v40 }
 0x144   : > { %v569_v43 = vpop.f32.mrf.mxu1 }
 0x145   : > { %v570_v46 = vadd.f32 %v1711_v25, %v569_v43 }
 0x147   : > { %v606_v53 = vmax.f32 %v570_v46, 0.0 }
 0x14c   : > { %v571_v47 = vpop.f32.mrf.mxu1 }
 0x14d   : > { %v572_v48 = vadd.f32 %v1711_v25, %v571_v47 }
 0x14f   : > { %v607_v54 = vmax.f32 %v572_v48, 0.0 }
 0x151   : > { %v621_v57 = vpack.c.bf16 %v607_v54, %v606_v53  ;;  %v1427_v53 = vld [vmem:[%s1994_s3 + $0x78] sm:$0xff] }
 0x152   : > { %855 = vmatpush.bf16.msrb.mxu3 %v1427_v53 }
 0x153   : > { %709 = vmatmul.bf16.gmra.mxu2 %v621_v57  ;;  %v1426_v57 = vld [vmem:[%s1994_s3 + $0x70] sm:$0xff] }
 0x154   : > { %v574_v60 = vpop.f32.mrf.mxu1 }
 0x155   : > { %v575_v61 = vadd.f32 %v1711_v25, %v574_v60  ;;  %v1425_v60 = vld [vmem:[%s1994_s3 + $0x68] sm:$0xff] }
 0x156   : > { %856 = vmatpush.bf16.msrb.mxu3 %v1426_v57 }
 0x157   : > { %v608_v4 = vmax.f32 %v575_v61, 0.0 }
 0x15a   : > { %857 = vmatpush.bf16.msrb.mxu3 %v1425_v60 }
 0x15c   : > { %v576_v62 = vpop.f32.mrf.mxu1 }
 0x15d   : > { %v577_v63 = vadd.f32 %v1711_v25, %v576_v62 }
 0x15f   : > { %v609_v5 = vmax.f32 %v577_v63, 0.0 }
 0x161   : > { %v622_v6 = vpack.c.bf16 %v609_v5, %v608_v4  ;;  %v1424_v4 = vld [vmem:[%s1994_s3 + $0x60] sm:$0xff] }
 0x162   : > { %858 = vmatpush.bf16.msrb.mxu3 %v1424_v4 }
 0x163   : > { %714 = vmatmul.bf16.gmra.mxu2 %v622_v6 }
 0x164   : > { %v579_v7 = vpop.f32.mrf.mxu1 }
 0x165   : > { %v580_v8 = vadd.f32 %v1711_v25, %v579_v7 }
 0x167   : > { %v610_v15 = vmax.f32 %v580_v8, 0.0 }
 0x16c   : > { %v581_v11 = vpop.f32.mrf.mxu1 }
 0x16d   : > { %v582_v12 = vadd.f32 %v1711_v25, %v581_v11  ;;  %v1423_v11 = vld [vmem:[%s1994_s3 + $0x58] sm:$0xff] }
 0x16e   : > { %859 = vmatpush.bf16.msrb.mxu3 %v1423_v11 }
 0x16f   : > { %v611_v16 = vmax.f32 %v582_v12, 0.0  ;;  %v1422_v12 = vld [vmem:[%s1994_s3 + $0x50] sm:$0xff] }
 0x171   : > { %v623_v17 = vpack.c.bf16 %v611_v16, %v610_v15 }
 0x172   : > { %860 = vmatpush.bf16.msrb.mxu3 %v1422_v12 }
 0x173   : > { %719 = vmatmul.bf16.gmra.mxu2 %v623_v17 }
 0x174   : > { %v584_v18 = vpop.f32.mrf.mxu1 }
 0x175   : > { %v585_v21 = vadd.f32 %v1711_v25, %v584_v18  ;;  %v1421_v18 = vld [vmem:[%s1994_s3 + $0x48] sm:$0xff] }
 0x176   : > { %861 = vmatpush.bf16.msrb.mxu3 %v1421_v18 }
 0x177   : > { %v612_v31 = vmax.f32 %v585_v21, 0.0 }
 0x17c   : > { %v586_v24 = vpop.f32.mrf.mxu1 }
 0x17d   : > { %v587_v27 = vadd.f32 %v1711_v25, %v586_v24 }
 0x17f   : > { %v613_v32 = vmax.f32 %v587_v27, 0.0 }
 0x181   : > { %v624_v33 = vpack.c.bf16 %v613_v32, %v612_v31  ;;  %v1420_v31 = vld [vmem:[%s1994_s3 + $0x40] sm:$0xff] }
 0x182   : > { %862 = vmatpush.bf16.msrb.mxu3 %v1420_v31 }
 0x183   : > { %724 = vmatmul.bf16.gmra.mxu2 %v624_v33  ;;  %v1756_v33 = vld [vmem:[%s1997_s6] ss:$0 sm:$0xff] }
 0x184   : > { %v589_v35 = vpop.f32.mrf.mxu1 }
 0x185   : > { %v590_v39 = vadd.f32 %v1711_v25, %v589_v35 }
 0x187   : > { %v614_v46 = vmax.f32 %v590_v39, 0.0 }
 0x18c   : > { %v591_v40 = vpop.f32.mrf.mxu1 }
 0x18d   : > { %v592_v43 = vadd.f32 %v1711_v25, %v591_v40 }
 0x18f   : > { %v615_v47 = vmax.f32 %v592_v43, 0.0 }
 0x191   : > { %v625_v48 = vpack.c.bf16 %v615_v47, %v614_v46 }
 0x193   : > { %729 = vmatmul.bf16.gmra.mxu2 %v625_v48 }
 0x194   : > { %v594_v54 = vpop.f32.mrf.mxu1 }
 0x195   : > { %v595_v61 = vadd.f32 %v1711_v25, %v594_v54 }
 0x197   : > { %v616_v5 = vmax.f32 %v595_v61, 0.0 }
 0x19c   : > { %v596_v62 = vpop.f32.mrf.mxu1 }
 0x19d   : > { %v597_v63 = vadd.f32 %v1711_v25, %v596_v62 }
 0x19f   : > { %v617_v6 = vmax.f32 %v597_v63, 0.0 }
 0x1a1   : > { %v626_v7 = vpack.c.bf16 %v617_v6, %v616_v5 }
 0x1a3   : > { %734 = vmatmul.bf16.gmra.mxu2 %v626_v7 }
 0x1a4   : > { %v599_v8 = vpop.f32.mrf.mxu1 }
 0x1a5   : > { %v600_v15 = vadd.f32 %v1711_v25, %v599_v8 }
 0x1a7   : > { %v618_v21 = vmax.f32 %v600_v15, 0.0 }
 0x1ac   : > { %v601_v16 = vpop.f32.mrf.mxu1 }
 0x1ad   : > { %v602_v17 = vadd.f32 %v1711_v25, %v601_v16 }
 0x1af   : > { %v619_v24 = vmax.f32 %v602_v17, 0.0 }
 0x1b1   : > { %v627_v27 = vpack.c.bf16 %v619_v24, %v618_v21 }
 0x1b3   : > { %739 = vmatmul.bf16.gmra.mxu2 %v627_v27 }
 0x1c6   : > { %v705_v32 = vpop.f32.mrf.mxu2 }
 0x1c7   : > { %v706_v25 = vadd.f32 %v1756_v33, %v705_v32 }
 0x1c9   : > { %v1761_v39 = vadd.f32 %v706_v25, %v463_v29 }
 0x1cb   : > { %v761_v46 = vmax.f32 %v1761_v39, 0.0 }
 0x1ce   : > { %v707_v35 = vpop.f32.mrf.mxu2 }
 0x1cf   : > { %v708_v40 = vadd.f32 %v1756_v33, %v707_v35 }
 0x1d1   : > { %v1766_v43 = vadd.f32 %v708_v40, %v464_v30 }
 0x1d3   : > { %v762_v47 = vmax.f32 %v1766_v43, 0.0 }
 0x1d5   : > { %v777_v48 = vpack.c.bf16 %v762_v47, %v761_v46 }
 0x1d6   : > { %v710_v53 = vpop.f32.mrf.mxu2 }
 0x1d7   : > { %863 = vmatmul.bf16.vlgmr.msrb.gmra.mxu3 %v777_v48  ;;  %v711_v26 = vadd.f32 %v1756_v33, %v710_v53 }
 0x1d9   : > { %v1777_v54 = vadd.f32 %v711_v26, %v465_v37 }
 0x1db   : > { %v763_v57 = vmax.f32 %v1777_v54, 0.0 }
 0x1de   : > { %v712_v29 = vpop.f32.mrf.mxu2 }
 0x1df   : > { %v713_v28 = vadd.f32 %v1756_v33, %v712_v29 }
 0x1e1   : > { %v1782_v30 = vadd.f32 %v713_v28, %v466_v38  ;;  %v1432_v28 = vld [vmem:[%s1996_s5 + $0x60] sm:$0xff] }
 0x1e3   : > { %v764_v60 = vmax.f32 %v1782_v30, 0.0 }
 0x1e5   : > { %v778_v61 = vpack.c.bf16 %v764_v60, %v763_v57 }
 0x1e6   : > { %v715_v62 = vpop.f32.mrf.mxu2 }
 0x1e7   : > { %868 = vmatmul.bf16.gmra.mxu3 %v778_v61  ;;  %v716_v34 = vadd.f32 %v1756_v33, %v715_v62 }
 0x1e9   : > { %v1793_v63 = vadd.f32 %v716_v34, %v467_v44  ;;  %v1430_v34 = vld [vmem:[%s1996_s5 + $0x50] sm:$0xff] }
 0x1eb   : > { %v765_v4 = vmax.f32 %v1793_v63, 0.0 }
 0x1ee   : > { %v717_v37 = vpop.f32.mrf.mxu2 }
 0x1ef   : > { %v718_v36 = vadd.f32 %v1756_v33, %v717_v37 }
 0x1f1   : > { %v1798_v38 = vadd.f32 %v718_v36, %v468_v45  ;;  %v1429_v36 = vld [vmem:[%s1996_s5 + $0x48] sm:$0xff] }
 0x1f3   : > { %v766_v5 = vmax.f32 %v1798_v38, 0.0 }
 0x1f5   : > { %v779_v6 = vpack.c.bf16 %v766_v5, %v765_v4 }
 0x1f6   : > { %v720_v7 = vpop.f32.mrf.mxu2 }
 0x1f7   : > { %873 = vmatmul.bf16.gmra.mxu3 %v779_v6  ;;  %v721_v41 = vadd.f32 %v1756_v33, %v720_v7 }
 0x1f9   : > { %v1809_v8 = vadd.f32 %v721_v41, %v469_v51 }
 0x1fb   : > { %v767_v11 = vmax.f32 %v1809_v8, 0.0 }
 0x1fe   : > { %v722_v44 = vpop.f32.mrf.mxu2 }
 0x1ff   : > { %v723_v42 = vadd.f32 %v1756_v33, %v722_v44 }
 0x201   : > { %v1814_v45 = vadd.f32 %v723_v42, %v470_v52 }
 0x203   : > { %v768_v12 = vmax.f32 %v1814_v45, 0.0 }
 0x205   : > { %v780_v15 = vpack.c.bf16 %v768_v12, %v767_v11 }
 0x206   : > { %v725_v16 = vpop.f32.mrf.mxu2 }
 0x207   : > { %878 = vmatmul.bf16.gmra.mxu3 %v780_v15  ;;  %v726_v49 = vadd.f32 %v1756_v33, %v725_v16  ;;  %v1428_v15 = vld [vmem:[%s1996_s5 + $0x40] sm:$0xff] }
 0x209   : > { %v1825_v17 = vadd.f32 %v726_v49, %v471_v58 }
 0x20b   : > { %v769_v18 = vmax.f32 %v1825_v17, 0.0 }
 0x20e   : > { %v727_v51 = vpop.f32.mrf.mxu2 }
 0x20f   : > { %v728_v50 = vadd.f32 %v1756_v33, %v727_v51 }
 0x211   : > { %v1830_v52 = vadd.f32 %v728_v50, %v472_v59 }
 0x213   : > { %v770_v21 = vmax.f32 %v1830_v52, 0.0 }
 0x215   : > { %v781_v24 = vpack.c.bf16 %v770_v21, %v769_v18 }
 0x216   : > { %v730_v27 = vpop.f32.mrf.mxu2 }
 0x217   : > { %883 = vmatmul.bf16.gmra.mxu3 %v781_v24  ;;  %v731_v55 = vadd.f32 %v1756_v33, %v730_v27 }
 0x219   : > { %v1841_v31 = vadd.f32 %v731_v55, %v473_v2 }
 0x21b   : > { %v771_v32 = vmax.f32 %v1841_v31, 0.0 }
 0x21e   : > { %v732_v58 = vpop.f32.mrf.mxu2 }
 0x21f   : > { %v733_v56 = vadd.f32 %v1756_v33, %v732_v58 }
 0x221   : > { %v1846_v59 = vadd.f32 %v733_v56, %v474_v3  ;;  %v1433_v3 = vld [vmem:[%s1996_s5 + $0x68] sm:$0xff] }
 0x222   : > { %1000 = vmatpush.bf16.msrb.mxu0 %v1433_v3 }
 0x223   : > { %v772_v25 = vmax.f32 %v1846_v59, 0.0 }
 0x225   : > { %v782_v35 = vpack.c.bf16 %v772_v25, %v771_v32 }
 0x226   : > { %v735_v40 = vpop.f32.mrf.mxu2  ;;  %1001 = vmatpush.bf16.msrb.mxu0 %v1432_v28 }
 0x227   : > { %888 = vmatmul.bf16.gmra.mxu3 %v782_v35  ;;  %v736_v2 = vadd.f32 %v1756_v33, %v735_v40 }
 0x229   : > { %v1866_v53 = vadd.f32 %v736_v2, %v475_v13 }
 0x22a   : > { %1002 = vmatpush.bf16.msrb.mxu0 %v1431_v10 }
 0x22b   : > { %v773_v61 = vmax.f32 %v1866_v53, 0.0 }
 0x22e   : > { %v737_v48 = vpop.f32.mrf.mxu2  ;;  %1003 = vmatpush.bf16.msrb.mxu0 %v1430_v34 }
 0x22f   : > { %v738_v26 = vadd.f32 %v1756_v33, %v737_v48 }
 0x231   : > { %v1871_v29 = vadd.f32 %v738_v26, %v476_v14 }
 0x232   : > { %1004 = vmatpush.bf16.msrb.mxu0 %v1429_v36 }
 0x233   : > { %v774_v62 = vmax.f32 %v1871_v29, 0.0 }
 0x235   : > { %v783_v9 = vpack.c.bf16 %v774_v62, %v773_v61 }
 0x236   : > { %v740_v13 = vpop.f32.mrf.mxu2  ;;  %1005 = vmatpush.bf16.msrb.mxu0 %v1428_v15 }
 0x237   : > { %893 = vmatmul.bf16.gmra.mxu3 %v783_v9  ;;  %v741_v14 = vadd.f32 %v1756_v33, %v740_v13 }
 0x239   : > { %v1894_v6 = vadd.f32 %v741_v14, %v477_v22 }
 0x23b   : > { %v775_v44 = vmax.f32 %v1894_v6, 0.0 }
 0x23e   : > { %v742_v37 = vpop.f32.mrf.mxu2 }
 0x23f   : > { %v743_v7 = vadd.f32 %v1756_v33, %v742_v37 }
 0x241   : > { %v1899_v41 = vadd.f32 %v743_v7, %v478_v23 }
 0x243   : > { %v776_v42 = vmax.f32 %v1899_v41, 0.0 }
 0x245   : > { %v784_v19 = vpack.c.bf16 %v776_v42, %v775_v44 }
 0x247   : > { %898 = vmatmul.bf16.gmra.mxu3 %v784_v19 }
 0x25a   : > { %v864_v22 = vpop.f32.mrf.mxu3 }
 0x25b   : > { %v865_v23 = vadd.f32 %v1471_v20, %v864_v22 }
 0x25d   : > { %v904_v49 = vmax.f32 %v865_v23, 0.0 }
 0x262   : > { %v866_v33 = vpop.f32.mrf.mxu3 }
 0x263   : > { %v867_v16 = vadd.f32 %v1471_v20, %v866_v33 }
 0x265   : > { %v905_v51 = vmax.f32 %v867_v16, 0.0 }
 0x267   : > { %v920_v50 = vpack.c.bf16 %v905_v51, %v904_v49 }
 0x269   : > { %1006 = vmatmul.bf16.vlgmr.msrb.gmra.mxu0 %v920_v50 }
 0x26a   : > { %v869_v24 = vpop.f32.mrf.mxu3 }
 0x26b   : > { %v870_v27 = vadd.f32 %v1471_v20, %v869_v24 }
 0x26d   : > { %v906_v56 = vmax.f32 %v870_v27, 0.0 }
 0x272   : > { %v871_v55 = vpop.f32.mrf.mxu3 }
 0x273   : > { %v872_v58 = vadd.f32 %v1471_v20, %v871_v55 }
 0x275   : > { %v907_v35 = vmax.f32 %v872_v58, 0.0 }
 0x277   : > { %v921_v40 = vpack.c.bf16 %v907_v35, %v906_v56 }
 0x279   : > { %1011 = vmatmul.bf16.gmra.mxu0 %v921_v40 }
 0x27a   : > { %v874_v0 = vpop.f32.mrf.mxu3 }
 0x27b   : > { %v875_v1 = vadd.f32 %v1471_v20, %v874_v0 }
 0x27d   : > { %v908_v48 = vmax.f32 %v875_v1, 0.0 }
 0x282   : > { %v876_v2 = vpop.f32.mrf.mxu3 }
 0x283   : > { %v877_v3 = vadd.f32 %v1471_v20, %v876_v2 }
 0x285   : > { %v909_v26 = vmax.f32 %v877_v3, 0.0 }
 0x287   : > { %v922_v28 = vpack.c.bf16 %v909_v26, %v908_v48 }
 0x289   : > { %1016 = vmatmul.bf16.gmra.mxu0 %v922_v28 }
 0x28a   : > { %v879_v9 = vpop.f32.mrf.mxu3 }
 0x28b   : > { %v880_v10 = vadd.f32 %v1471_v20, %v879_v9 }
 0x28d   : > { %v910_v34 = vmax.f32 %v880_v10, 0.0 }
 0x292   : > { %v881_v13 = vpop.f32.mrf.mxu3 }
 0x293   : > { %v882_v14 = vadd.f32 %v1471_v20, %v881_v13 }
 0x295   : > { %v911_v37 = vmax.f32 %v882_v14, 0.0 }
 0x297   : > { %v923_v36 = vpack.c.bf16 %v911_v37, %v910_v34  ;;  %v1916_v34 = vld [vmem:[%s1997_s6 + $0x1] ss:$0 sm:$0xff] }
 0x299   : > { %1021 = vmatmul.bf16.gmra.mxu0 %v923_v36 }
 0x29a   : > { %v884_v7 = vpop.f32.mrf.mxu3 }
 0x29b   : > { %v885_v15 = vadd.f32 %v1471_v20, %v884_v7 }
 0x29d   : > { %v912_v23 = vmax.f32 %v885_v15, 0.0 }
 0x2a2   : > { %v886_v19 = vpop.f32.mrf.mxu3 }
 0x2a3   : > { %v887_v22 = vadd.f32 %v1471_v20, %v886_v19 }
 0x2a5   : > { %v913_v33 = vmax.f32 %v887_v22, 0.0 }
 0x2a7   : > { %v924_v16 = vpack.c.bf16 %v913_v33, %v912_v23 }
 0x2a9   : > { %1026 = vmatmul.bf16.gmra.mxu0 %v924_v16 }
 0x2aa   : > { %v889_v49 = vpop.f32.mrf.mxu3 }
 0x2ab   : > { %v890_v51 = vadd.f32 %v1471_v20, %v889_v49 }
 0x2ad   : > { %v914_v27 = vmax.f32 %v890_v51, 0.0 }
 0x2b2   : > { %v891_v50 = vpop.f32.mrf.mxu3 }
 0x2b3   : > { %v892_v24 = vadd.f32 %v1471_v20, %v891_v50 }
 0x2b5   : > { %v915_v55 = vmax.f32 %v892_v24, 0.0 }
 0x2b7   : > { %v925_v58 = vpack.c.bf16 %v915_v55, %v914_v27 }
 0x2b9   : > { %1031 = vmatmul.bf16.gmra.mxu0 %v925_v58 }
 0x2ba   : > { %v894_v56 = vpop.f32.mrf.mxu3 }
 0x2bb   : > { %v895_v35 = vadd.f32 %v1471_v20, %v894_v56 }
 0x2bd   : > { %v916_v1 = vmax.f32 %v895_v35, 0.0 }
 0x2c2   : > { %v896_v40 = vpop.f32.mrf.mxu3 }
 0x2c3   : > { %v897_v0 = vadd.f32 %v1471_v20, %v896_v40 }
 0x2c5   : > { %v917_v2 = vmax.f32 %v897_v0, 0.0 }
 0x2c7   : > { %v926_v3 = vpack.c.bf16 %v917_v2, %v916_v1 }
 0x2c9   : > { %1036 = vmatmul.bf16.gmra.mxu0 %v926_v3 }
 0x2ca   : > { %v899_v48 = vpop.f32.mrf.mxu3 }
 0x2cb   : > { %v900_v26 = vadd.f32 %v1471_v20, %v899_v48 }
 0x2cd   : > { %v918_v10 = vmax.f32 %v900_v26, 0.0 }
 0x2d2   : > { %v901_v28 = vpop.f32.mrf.mxu3 }
 0x2d3   : > { %v902_v9 = vadd.f32 %v1471_v20, %v901_v28 }
 0x2d5   : > { %v919_v13 = vmax.f32 %v902_v9, 0.0 }
 0x2d7   : > { %v927_v14 = vpack.c.bf16 %v919_v13, %v918_v10 }
 0x2d9   : > { %1041 = vmatmul.bf16.gmra.mxu0 %v927_v14 }
 0x2e6   : > { %v1007_v37 = vpop.f32.mrf.mxu0 }
 0x2e7   : > { %v1008_v36 = vadd.f32 %v1916_v34, %v1007_v37 }
 0x2e9   : > { %v1047_v7 = vadd.f32 %v1008_v36, %v761_v46 }
 0x2eb   : > { %v1063_v20 = vmax.f32 %v1047_v7, 0.0 }
 0x2ed   : > { %1079 = vst [vmem:[%s1925_s17] sm:$0xff] %v1063_v20 }
 0x2ee   : > { %v1009_v15 = vpop.f32.mrf.mxu0 }
 0x2ef   : > { %v1010_v19 = vadd.f32 %v1916_v34, %v1009_v15 }
 0x2f1   : > { %v1048_v22 = vadd.f32 %v1010_v19, %v762_v47 }
 0x2f3   : > { %v1064_v23 = vmax.f32 %v1048_v22, 0.0 }
 0x2f5   : > { %1080 = vst [vmem:[%s1925_s17 + $0x8] sm:$0xff] %v1064_v23 }
 0x2f6   : > { %v1012_v39 = vpop.f32.mrf.mxu0 }
 0x2f7   : > { %v1013_v46 = vadd.f32 %v1916_v34, %v1012_v39 }
 0x2f9   : > { %v1049_v33 = vadd.f32 %v1013_v46, %v763_v57 }
 0x2fb   : > { %v1065_v16 = vmax.f32 %v1049_v33, 0.0 }
 0x2fd   : > { %1081 = vst [vmem:[%s1925_s17 + $0x10] sm:$0xff] %v1065_v16 }
 0x2fe   : > { %v1014_v49 = vpop.f32.mrf.mxu0 }
 0x2ff   : > { %v1015_v51 = vadd.f32 %v1916_v34, %v1014_v49 }
 0x301   : > { %v1050_v50 = vadd.f32 %v1015_v51, %v764_v60 }
 0x303   : > { %v1066_v43 = vmax.f32 %v1050_v50, 0.0 }
 0x305   : > { %1082 = vst [vmem:[%s1925_s17 + $0x18] sm:$0xff] %v1066_v43 }
 0x306   : > { %v1017_v47 = vpop.f32.mrf.mxu0 }
 0x307   : > { %v1018_v24 = vadd.f32 %v1916_v34, %v1017_v47 }
 0x309   : > { %v1051_v27 = vadd.f32 %v1018_v24, %v765_v4 }
 0x30b   : > { %v1067_v54 = vmax.f32 %v1051_v27, 0.0 }
 0x30d   : > { %1083 = vst [vmem:[%s1925_s17 + $0x20] sm:$0xff] %v1067_v54 }
 0x30e   : > { %v1019_v57 = vpop.f32.mrf.mxu0 }
 0x30f   : > { %v1020_v55 = vadd.f32 %v1916_v34, %v1019_v57 }
 0x311   : > { %v1052_v58 = vadd.f32 %v1020_v55, %v766_v5 }
 0x313   : > { %v1068_v30 = vmax.f32 %v1052_v58, 0.0 }
 0x315   : > { %1084 = vst [vmem:[%s1925_s17 + $0x28] sm:$0xff] %v1068_v30 }
 0x316   : > { %v1022_v60 = vpop.f32.mrf.mxu0 }
 0x317   : > { %v1023_v56 = vadd.f32 %v1916_v34, %v1022_v60 }
 0x319   : > { %v1053_v35 = vadd.f32 %v1023_v56, %v767_v11 }
 0x31b   : > { %v1069_v63 = vmax.f32 %v1053_v35, 0.0 }
 0x31d   : > { %1085 = vst [vmem:[%s1925_s17 + $0x30] sm:$0xff] %v1069_v63 }
 0x31e   : > { %v1024_v4 = vpop.f32.mrf.mxu0 }
 0x31f   : > { %v1025_v40 = vadd.f32 %v1916_v34, %v1024_v4 }
 0x321   : > { %v1054_v0 = vadd.f32 %v1025_v40, %v768_v12 }
 0x323   : > { %v1070_v38 = vmax.f32 %v1054_v0, 0.0 }
 0x325   : > { %1086 = vst [vmem:[%s1925_s17 + $0x38] sm:$0xff] %v1070_v38 }
 0x326   : > { %v1027_v5 = vpop.f32.mrf.mxu0 }
 0x327   : > { %v1028_v1 = vadd.f32 %v1916_v34, %v1027_v5 }
 0x329   : > { %v1055_v2 = vadd.f32 %v1028_v1, %v769_v18 }
 0x32b   : > { %v1071_v8 = vmax.f32 %v1055_v2, 0.0 }
 0x32d   : > { %1087 = vst [vmem:[%s1925_s17 + $0x40] sm:$0xff] %v1071_v8 }
 0x32e   : > { %v1029_v11 = vpop.f32.mrf.mxu0 }
 0x32f   : > { %v1030_v3 = vadd.f32 %v1916_v34, %v1029_v11 }
 0x331   : > { %v1056_v48 = vadd.f32 %v1030_v3, %v770_v21 }
 0x333   : > { %v1072_v45 = vmax.f32 %v1056_v48, 0.0 }
 0x335   : > { %1088 = vst [vmem:[%s1925_s17 + $0x48] sm:$0xff] %v1072_v45 }
 0x336   : > { %v1032_v12 = vpop.f32.mrf.mxu0 }
 0x337   : > { %v1033_v26 = vadd.f32 %v1916_v34, %v1032_v12 }
 0x339   : > { %v1057_v28 = vadd.f32 %v1033_v26, %v771_v32 }
 0x33b   : > { %v1073_v17 = vmax.f32 %v1057_v28, 0.0 }
 0x33d   : > { %1089 = vst [vmem:[%s1925_s17 + $0x50] sm:$0xff] %v1073_v17 }
 0x33e   : > { %v1034_v18 = vpop.f32.mrf.mxu0 }
 0x33f   : > { %v1035_v9 = vadd.f32 %v1916_v34, %v1034_v18 }
 0x341   : > { %v1058_v10 = vadd.f32 %v1035_v9, %v772_v25 }
 0x343   : > { %v1074_v52 = vmax.f32 %v1058_v10, 0.0 }
 0x345   : > { %1090 = vst [vmem:[%s1925_s17 + $0x58] sm:$0xff] %v1074_v52 }
 0x346   : > { %v1037_v21 = vpop.f32.mrf.mxu0 }
 0x347   : > { %v1038_v13 = vadd.f32 %v1916_v34, %v1037_v21 }
 0x349   : > { %v1059_v14 = vadd.f32 %v1038_v13, %v773_v61 }
 0x34b   : > { %v1075_v31 = vmax.f32 %v1059_v14, 0.0 }
 0x34d   : > { %1091 = vst [vmem:[%s1925_s17 + $0x60] sm:$0xff] %v1075_v31 }
 0x34e   : > { %v1039_v32 = vpop.f32.mrf.mxu0 }
 0x34f   : > { %v1040_v37 = vadd.f32 %v1916_v34, %v1039_v32 }
 0x351   : > { %v1060_v36 = vadd.f32 %v1040_v37, %v774_v62 }
 0x353   : > { %v1076_v59 = vmax.f32 %v1060_v36, 0.0 }
 0x355   : > { %1092 = vst [vmem:[%s1925_s17 + $0x68] sm:$0xff] %v1076_v59 }
 0x356   : > { %v1042_v25 = vpop.f32.mrf.mxu0 }
 0x357   : > { %v1043_v7 = vadd.f32 %v1916_v34, %v1042_v25 }
 0x359   : > { %v1061_v20 = vadd.f32 %v1043_v7, %v775_v44 }
 0x35b   : > { %v1077_v15 = vmax.f32 %v1061_v20, 0.0 }
 0x35d   : > { %1093 = vst [vmem:[%s1925_s17 + $0x70] sm:$0xff] %v1077_v15 }
 0x35e   : > { %v1044_v53 = vpop.f32.mrf.mxu0 }
 0x35f   : > { %v1045_v61 = vadd.f32 %v1916_v34, %v1044_v53 }
 0x361   : > { %v1062_v19 = vadd.f32 %v1045_v61, %v776_v42 }
 0x363   : > { %v1078_v22 = vmax.f32 %v1062_v19, 0.0 }
 0x365   : > { %1094 = vst [vmem:[%s1925_s17 + $0x78] sm:$0xff] %v1078_v22 }
 0x366 PF: > { %s17_s24 = sadd.s32 1, %s1479_s24  }
 0x367   : > { %p14_p4 = scmp.ge.s32.totalorder %s17_s24, 4  }
 0x369   :  { %16 = sbr.rel (!%p14_p4) target bundleno = 1 (0x1), region = 82 }

</bundles_post_ra>
